<compile_context>
chip_gen: v7x
topology: tpu7x:2x2x1
jax: 0.10.0
libtpu: 0.0.40
codegen_flags: <defaults>
</compile_context>

<pallas_src>
import functools

import jax
import jax.numpy as jnp
from jax.experimental import pallas as pl
from jax.experimental.pallas import tpu as pltpu


# ----------------------------- Pallas kernel -------------------------------

def _discriminator_kernel(x_ref, w1_ref, b1_ref, w2_ref, b2_ref, o_ref):
    # layer 1: (tm, F) @ (F, H) -> (tm, H) on the MXU, f32 accumulation
    h = jnp.dot(x_ref[...], w1_ref[...], preferred_element_type=jnp.float32)
    h = jnp.maximum(h + b1_ref[...], 0.0)          # bias + ReLU on the VPU
    # layer 2: (tm, H) @ (H, Dp) -> (tm, Dp)  (Dp = lane-padded logit dim)
    out = jnp.dot(h, w2_ref[...], preferred_element_type=jnp.float32)
    out = out + b2_ref[...]
    o_ref[...] = out.astype(o_ref.dtype)


# ------------------------------- wrapper ------------------------------------

def discriminator_forward(x, rate, w1, b1, w2, b2, *, tm=128):
    """Pallas implementation of discriminator.forward(x, rate).

    `rate` only affects the backward pass of the gradient-reversal layer; the
    forward pass is the identity, so it is accepted for API parity and unused.
    """
    del rate  # GRL forward = identity; rate only matters for gradients.

    N, F = x.shape
    H = w1.shape[1]
    D = w2.shape[1]
    LANE = 128

    # Lane-dense output: pad logits (D=2) up to a multiple of 128 lanes so the
    # final store is an unmasked vst; slice back afterwards.
    Dp = max(LANE, ((D + LANE - 1) // LANE) * LANE)
    w2_p = jnp.pad(w2.astype(jnp.float32), ((0, 0), (0, Dp - D)))
    b2_p = jnp.pad(b2.astype(jnp.float32), ((0, Dp - D),)).reshape(1, Dp)
    b1_2d = b1.astype(jnp.float32).reshape(1, H)

    # Pad the row dimension to a multiple of the row tile.
    Np = ((N + tm - 1) // tm) * tm
    x_p = x.astype(jnp.float32)
    if Np != N:
        x_p = jnp.pad(x_p, ((0, Np - N), (0, 0)))

    grid = (Np // tm,)

    out_padded = pl.pallas_call(
        _discriminator_kernel,
        out_shape=jax.ShapeDtypeStruct((Np, Dp), jnp.float32),
        grid_spec=pltpu.PrefetchScalarGridSpec(
            num_scalar_prefetch=0,
            grid=grid,
            in_specs=[
                pl.BlockSpec((tm, F), lambda i: (i, 0)),   # x row tile (streamed)
                pl.BlockSpec((F, H), lambda i: (0, 0)),    # W1 (resident)
                pl.BlockSpec((1, H), lambda i: (0, 0)),    # b1 (resident)
                pl.BlockSpec((H, Dp), lambda i: (0, 0)),   # W2 (resident, lane-padded)
                pl.BlockSpec((1, Dp), lambda i: (0, 0)),   # b2 (resident, lane-padded)
            ],
            out_specs=pl.BlockSpec((tm, Dp), lambda i: (i, 0)),
        ),
        compiler_params=pltpu.CompilerParams(
            dimension_semantics=("parallel",),   # rows split across TCs on v7x
            vmem_limit_bytes=64 << 20,
        ),
    )(x_p, w1.astype(jnp.float32), b1_2d, w2_p, b2_p)

    return out_padded[:N, :D]


# ------------------------- pure-JAX reference --------------------------------

def _reference(x, w1, b1, w2, b2):
    h = jnp.maximum(x @ w1 + b1[None, :], 0.0)
    return h @ w2 + b2[None, :]


# ---------------------------------- main -------------------------------------

if __name__ == "__main__":
    key = jax.random.PRNGKey(0)
    k_x, k_w1, k_b1, k_w2, k_b2 = jax.random.split(key, 5)

    N = 256          # number of samples / nodes fed to the discriminator
    in_feats = 32    # input embedding dim
    hidden_dim = 64  # hidden layer width
    out_dim = 2      # binary domain logits

    x = jax.random.normal(k_x, (N, in_feats), dtype=jnp.float32)
    rate = 1.0

    # torch.nn.Linear-style init: U(-1/sqrt(fan_in), 1/sqrt(fan_in))
    lim1 = 1.0 / (in_feats ** 0.5)
    w1 = jax.random.uniform(k_w1, (in_feats, hidden_dim), jnp.float32, -lim1, lim1)
    b1 = jax.random.uniform(k_b1, (hidden_dim,), jnp.float32, -lim1, lim1)
    lim2 = 1.0 / (hidden_dim ** 0.5)
    w2 = jax.random.uniform(k_w2, (hidden_dim, out_dim), jnp.float32, -lim2, lim2)
    b2 = jax.random.uniform(k_b2, (out_dim,), jnp.float32, -lim2, lim2)

    out = discriminator_forward(x, rate, w1, b1, w2, b2)
    jax.block_until_ready(out)

    ref = _reference(x, w1, b1, w2, b2)
    assert out.shape == (N, out_dim), f"bad shape {out.shape}"
    assert jnp.allclose(out, ref, atol=2e-2, rtol=2e-2), "mismatch vs reference"

    print("KERNEL_OK")
</pallas_src>

<mosaic_0001>
module attributes {stable_mosaic.version = 11 : i64} {
  func.func @_discriminator_kernel(%arg0: i32, %arg1: memref<128x32xf32, #tpu.memory_space<vmem>>, %arg2: memref<32x64xf32, #tpu.memory_space<vmem>>, %arg3: memref<1x64xf32, #tpu.memory_space<vmem>>, %arg4: memref<64x128xf32, #tpu.memory_space<vmem>>, %arg5: memref<1x128xf32, #tpu.memory_space<vmem>>, %arg6: memref<128x128xf32, #tpu.memory_space<vmem>>) attributes {dimension_semantics = [#tpu.dimension_semantics<parallel>], iteration_bounds = array<i64: 2>, scalar_prefetch = 0 : i64, scratch_operands = 0 : i64, tpu.core_type = #tpu.core_type<tc>, window_params = [{transform_indices = @transform_0, window_bounds = array<i64: 128, 32>}, {pipeline_mode = #tpu.pipeline_mode<synchronous>, transform_indices = @transform_1, window_bounds = array<i64: 32, 64>}, {pipeline_mode = #tpu.pipeline_mode<synchronous>, transform_indices = @transform_2, window_bounds = array<i64: 1, 64>}, {pipeline_mode = #tpu.pipeline_mode<synchronous>, transform_indices = @transform_3, window_bounds = array<i64: 64, 128>}, {pipeline_mode = #tpu.pipeline_mode<synchronous>, transform_indices = @transform_4, window_bounds = array<i64: 1, 128>}, {transform_indices = @transform_5, window_bounds = array<i64: 128, 128>}]} {
    %c0 = arith.constant 0 : index
    %c0_0 = arith.constant 0 : index
    %0 = vector.load %arg1[%c0, %c0_0] : memref<128x32xf32, #tpu.memory_space<vmem>>, vector<128x32xf32>
    %c0_1 = arith.constant 0 : index
    %c0_2 = arith.constant 0 : index
    %1 = vector.load %arg2[%c0_1, %c0_2] : memref<32x64xf32, #tpu.memory_space<vmem>>, vector<32x64xf32>
    %cst = arith.constant dense<0.000000e+00> : vector<128x64xf32>
    %2 = tpu.matmul %0, %1, %cst {dimension_numbers = #tpu.dot_dimension_numbers<[1], [0], [0], [1], [0, 0, 1, 1], [], []>} : vector<128x32xf32>, vector<32x64xf32>, vector<128x64xf32> -> vector<128x64xf32>
    %c0_3 = arith.constant 0 : index
    %c0_4 = arith.constant 0 : index
    %3 = vector.load %arg3[%c0_3, %c0_4] : memref<1x64xf32, #tpu.memory_space<vmem>>, vector<1x64xf32>
    %4 = vector.broadcast %3 : vector<1x64xf32> to vector<128x64xf32>
    %5 = arith.addf %2, %4 : vector<128x64xf32>
    %cst_5 = arith.constant 0.000000e+00 : f32
    %6 = vector.broadcast %cst_5 : f32 to vector<128x64xf32>
    %7 = arith.maximumf %5, %6 : vector<128x64xf32>
    %c0_6 = arith.constant 0 : index
    %c0_7 = arith.constant 0 : index
    %8 = vector.load %arg4[%c0_6, %c0_7] : memref<64x128xf32, #tpu.memory_space<vmem>>, vector<64x128xf32>
    %cst_8 = arith.constant dense<0.000000e+00> : vector<128x128xf32>
    %9 = tpu.matmul %7, %8, %cst_8 {dimension_numbers = #tpu.dot_dimension_numbers<[1], [0], [0], [1], [0, 0, 1, 1], [], []>} : vector<128x64xf32>, vector<64x128xf32>, vector<128x128xf32> -> vector<128x128xf32>
    %c0_9 = arith.constant 0 : index
    %c0_10 = arith.constant 0 : index
    %10 = vector.load %arg5[%c0_9, %c0_10] : memref<1x128xf32, #tpu.memory_space<vmem>>, vector<1x128xf32>
    %11 = vector.broadcast %10 : vector<1x128xf32> to vector<128x128xf32>
    %12 = arith.addf %9, %11 : vector<128x128xf32>
    %c0_11 = arith.constant 0 : index
    %c0_12 = arith.constant 0 : index
    %13 = vector.load %arg6[%c0_11, %c0_12] : memref<128x128xf32, #tpu.memory_space<vmem>>, vector<128x128xf32>
    tpu.vector_store %arg6[%c0_11, %c0_12], %12 {strides = array<i32>} : memref<128x128xf32, #tpu.memory_space<vmem>>, vector<128x128xf32>,
    return
  }
  func.func @transform_0(%arg0: i32) -> (i32, i32) {
    %c0_i32 = arith.constant 0 : i32
    %c0_i32_0 = arith.constant 0 : i32
    return %arg0, %c0_i32 : i32, i32
  }
  func.func @transform_1(%arg0: i32) -> (i32, i32) {
    %c0_i32 = arith.constant 0 : i32
    %c0_i32_0 = arith.constant 0 : i32
    %c0_i32_1 = arith.constant 0 : i32
    return %c0_i32, %c0_i32_0 : i32, i32
  }
  func.func @transform_2(%arg0: i32) -> (i32, i32) {
    %c0_i32 = arith.constant 0 : i32
    %c0_i32_0 = arith.constant 0 : i32
    %c0_i32_1 = arith.constant 0 : i32
    return %c0_i32, %c0_i32_0 : i32, i32
  }
  func.func @transform_3(%arg0: i32) -> (i32, i32) {
    %c0_i32 = arith.constant 0 : i32
    %c0_i32_0 = arith.constant 0 : i32
    %c0_i32_1 = arith.constant 0 : i32
    return %c0_i32, %c0_i32_0 : i32, i32
  }
  func.func @transform_4(%arg0: i32) -> (i32, i32) {
    %c0_i32 = arith.constant 0 : i32
    %c0_i32_0 = arith.constant 0 : i32
    %c0_i32_1 = arith.constant 0 : i32
    return %c0_i32, %c0_i32_0 : i32, i32
  }
  func.func @transform_5(%arg0: i32) -> (i32, i32) {
    %c0_i32 = arith.constant 0 : i32
    %c0_i32_0 = arith.constant 0 : i32
    return %arg0, %c0_i32 : i32, i32
  }
}

</mosaic_0001>

<bundles_post_ra>
// kernel: tpu_custom_call.1
= control target key start
LH: loop header
LB: loop body
LE: loop exit
PB: predicated region body
PF: predicated region fallthrough
CT: control target
= control target key end

     0   :  { %10 = vsyncpa [#allocation3], 0  ;;  %s1800_s0 = inlined_call_operand.hbm [shape: f32[256,32], index: 0, kind: input, shape index: {}]   ;;  %s1801_s1 = inlined_call_operand.hbm [shape: f32[32,64], index: 1, kind: input, shape index: {}]   ;;  %s1802_s2 = inlined_call_operand.hbm [shape: f32[1,64], index: 2, kind: input, shape index: {}]   ;;  %s1803_s3 = inlined_call_operand.hbm [shape: f32[64,128], index: 3, kind: input, shape index: {}]   ;;  %s1804_s4 = inlined_call_operand.hbm [shape: f32[1,128], index: 4, kind: input, shape index: {}]   ;;  %s1805_s5 = inlined_call_operand.hbm [shape: f32[256,128], index: 5, kind: output, shape index: {}]  }
   0x1   :  { %12 = vsyncpa [#allocation3 + $0x1], 0 }
   0x2   :  { %13 = vsyncpa [#allocation6], 0 }
   0x3   :  { %14 = vsyncpa [#allocation9], 0 }
   0x4   :  { %15 = vsyncpa [#allocation4], 0 }
   0x5   :  { %17 = vsyncpa [#allocation4 + $0x1], 0  ;;  %s1441_s18 = smov 0   ;;  %s1443_s19 = smov 0  }
   0x6   :  { %s1445_s20 = smov 0   ;;  %s1447_s21 = smov 0  }
   0x7 LB: > { %s1462_s22 = sadd.s32 4294967295, %s1399_s21   ;;  %s886_s23 = sadd.s32 4294967294, %s1399_s21   ;;  %s1399_s21 = sphi %s1447_s21, %s1828_s21   ;;  %s1395_s20 = sphi %s1445_s20, %s1827_s20   ;;  %s1391_s19 = sphi %s1443_s19, %s1826_s19   ;;  %s1387_s18 = sphi %s1441_s18, %s1825_s18  }
   0x8   : > { %p43_p0 = scmp.ne.s32.totalorder %s1391_s19, %s1387_s18  ;;  %p1806_p1 = scmp.eq.s32.totalorder %s1462_s22, 0 }
   0x9   : > { %p157_p3 = scmp.eq.s32.totalorder %s886_s23, 1  ;;  %p887_p5 = scmp.ge.s32.totalorder %s1399_s21, 1 }
   0xa   : > { %p1471_p4 = por %p1806_p1, %p43_p0  ;;  %p164_p7 = scmp.lt.s32.totalorder %s1399_s21, 3 }
   0xb   : > { %p1476_p6 = por %p157_p3, %p43_p0  ;;  %s1401_s27 = smov [#allocation5]  }
   0xc   : > { %s1809_s24 = scalar_select %p1471_p4, 1, 0 }
   0xd   : > { %s1810_s25 = scalar_select %p1476_p6, 1, 0 }
   0xe   : > { %p1481_p8 = pnand %p887_p5, %p164_p7  ;;  %s176_s28 = sshll.u32 %s1401_s27, 4  ;;  %s1485_s28 = int_to_ptr.vmem [resolvable:$true] %s176_s28 }
   0xf   : > { %s1402_s30 = smov [#allocation8]   ;;  %s1403_s7 = smov [#allocation7]  }
  0x10   : > { %s1811_s26 = scalar_select %p1481_p8, 1, 0 }
  0x11   : > { %p1112_p9 = pneg %p1481_p8  ;;  %s200_s6 = sshll.u32 %s1402_s30, 4  ;;  %s1496_s6 = int_to_ptr.vmem [resolvable:$true] %s200_s6 }
  0x12   : > { %s1498_s8 = sshll.u32 %s1403_s7, 4  ;;  %s1183_s11 = scalar_lea.hbm %s1801_s1, 512  ;;  %s191_s8 = int_to_ptr.vmem [resolvable:$true] %s1498_s8 }
  0x13   : > { %p1492_p11 = pnand %p1112_p9, %p1806_p1  ;;  %p1184_p12 = scmp.ne.s32.totalorder %s1801_s1, %s1183_s11 }
  0x14   : > { %p1190_p5 = scmp.lt.u32.totalorder %s1183_s11, %s1801_s1 }
  0x15   : > { %p1508_p13 = pneg %p1492_p11 }
  0x17   : > { %p1186_p0 = pnand %p1508_p13, %p1184_p12 }
  0x19   : > { %p1187_p3 = pneg %p1186_p0 }
  0x1b   : > { %p1192_p7 = pnand %p1190_p5, %p1187_p3 }
  0x1d   : > { %1195 = shalt.err (!%p1192_p7)
}
  0x1e   : > { %s1196_s17 = scalar_lea.vmem %s1485_s28, 512  ;;  %p1204_p2 = scmp.lt.s32.totalorder %s1485_s28, %s1485_s28 }
  0x1f   : > { %p1197_p9 = scmp.ne.s32.totalorder %s1485_s28, %s1196_s17  ;;  %p1205_p6 = scmp.lt.s32.totalorder %s1196_s17, %s1196_s17 }
  0x21   : > { %p1199_p10 = pnand %p1197_p9, %p1508_p13  ;;  %p1206_p12 = por %p1205_p6, %p1204_p2 }
  0x23   : > { %p1200_p1 = pneg %p1199_p10 }
  0x25   : > { %p1207_p0 = pnand %p1206_p12, %p1200_p1 }
  0x27   : > { %1210 = shalt.err (!%p1207_p0)
}
  0x28   : > { %s1404_s23 = smov 128   ;;  %s1405_s27 = smov 8  }
  0x29   : > { %1115 = dma.hbm_to_vmem [thread:$0]  (!%p1492_p11), %s1801_s1, 512, %s1485_s28, [#allocation6], %s1404_s23, %s1404_s23, %s1405_s27  }
  0x2a   : > { %s1211_s11 = scalar_lea.hbm %s1803_s3, 1024 }
  0x2b   : > { %p1212_p1 = scmp.ne.s32.totalorder %s1803_s3, %s1211_s11  ;;  %p1218_p10 = scmp.lt.u32.totalorder %s1211_s11, %s1803_s3 }
  0x2d   : > { %p1214_p2 = pnand %p1212_p1, %p1508_p13 }
  0x2f   : > { %p1215_p6 = pneg %p1214_p2 }
  0x31   : > { %p1220_p3 = pnand %p1218_p10, %p1215_p6 }
  0x33   : > { %1223 = shalt.err (!%p1220_p3)
}
  0x34   : > { %s1224_s28 = scalar_lea.vmem %s1496_s6, 1024  ;;  %p1232_p12 = scmp.lt.s32.totalorder %s1496_s6, %s1496_s6 }
  0x35   : > { %p1225_p5 = scmp.ne.s32.totalorder %s1496_s6, %s1224_s28  ;;  %p1233_p0 = scmp.lt.s32.totalorder %s1224_s28, %s1224_s28 }
  0x37   : > { %p1227_p7 = pnand %p1225_p5, %p1508_p13  ;;  %p1234_p1 = por %p1233_p0, %p1232_p12 }
  0x39   : > { %p1228_p9 = pneg %p1227_p7 }
  0x3b   : > { %p1235_p2 = pnand %p1234_p1, %p1228_p9 }
  0x3d   : > { %1238 = shalt.err (!%p1235_p2)
}
  0x3e   : > { %1121 = dma.hbm_to_vmem [thread:$0]  (!%p1492_p11), %s1803_s3, 1024, %s1496_s6, [#allocation9], %s1404_s23, %s1404_s23, %s1405_s27  }
  0x3f   : > { %s1239_s10 = scalar_lea.hbm %s1802_s2, 16 }
  0x40   : > { %p1240_p6 = scmp.ne.s32.totalorder %s1802_s2, %s1239_s10  ;;  %p1246_p5 = scmp.lt.u32.totalorder %s1239_s10, %s1802_s2 }
  0x42   : > { %p1242_p10 = pnand %p1240_p6, %p1508_p13 }
  0x44   : > { %p1243_p3 = pneg %p1242_p10 }
  0x46   : > { %p1248_p7 = pnand %p1246_p5, %p1243_p3 }
  0x48   : > { %1251 = shalt.err (!%p1248_p7)
}
  0x49   : > { %s1252_s16 = scalar_lea.vmem %s191_s8, 16  ;;  %s1259_s6 = scalar_lea.vmem %s191_s8, 32 }
  0x4a   : > { %p1253_p9 = scmp.ne.s32.totalorder %s191_s8, %s1252_s16  ;;  %p1260_p1 = scmp.lt.s32.totalorder %s191_s8, %s191_s8 }
  0x4b   : > { %p1261_p2 = scmp.lt.s32.totalorder %s1259_s6, %s1252_s16 }
  0x4c   : > { %p1255_p12 = pnand %p1253_p9, %p1508_p13 }
  0x4d   : > { %p1262_p4 = por %p1261_p2, %p1260_p1 }
  0x4e   : > { %p1256_p0 = pneg %p1255_p12 }
  0x50   : > { %p1263_p8 = pnand %p1262_p4, %p1256_p0 }
  0x52   : > { %1266 = shalt.err (!%p1263_p8)
}
  0x53   : > { %1118 = dma.hbm_to_vmem [thread:$0]  (!%p1492_p11), %s1802_s2, 16, %s191_s8, [#allocation6]  }
  0x54   : > { %s1406_s30 = smov [#allocation10]   ;;  %s1267_s11 = scalar_lea.hbm %s1804_s4, 16 }
  0x55   : > { %s214_s7 = sshll.u32 %s1406_s30, 4  ;;  %p1268_p6 = scmp.ne.s32.totalorder %s1804_s4, %s1267_s11  ;;  %s215_s7 = int_to_ptr.vmem [resolvable:$true] %s214_s7 }
  0x56   : > { %p1274_p10 = scmp.lt.u32.totalorder %s1267_s11, %s1804_s4 }
  0x57   : > { %p1270_p4 = pnand %p1268_p6, %p1508_p13 }
  0x59   : > { %p1271_p8 = pneg %p1270_p4 }
  0x5b   : > { %p1276_p3 = pnand %p1274_p10, %p1271_p8 }
  0x5d   : > { %1279 = shalt.err (!%p1276_p3)
}
  0x5e   : > { %s1280_s8 = scalar_lea.vmem %s215_s7, 16  ;;  %s1287_s6 = scalar_lea.vmem %s215_s7, 32 }
  0x5f   : > { %p1281_p5 = scmp.ne.s32.totalorder %s215_s7, %s1280_s8  ;;  %p1288_p12 = scmp.lt.s32.totalorder %s215_s7, %s215_s7 }
  0x60   : > { %p1289_p0 = scmp.lt.s32.totalorder %s1287_s6, %s1280_s8 }
  0x61   : > { %p1283_p7 = pnand %p1281_p5, %p1508_p13 }
  0x62   : > { %p1290_p1 = por %p1289_p0, %p1288_p12 }
  0x63   : > { %p1284_p9 = pneg %p1283_p7 }
  0x65   : > { %p1291_p2 = pnand %p1290_p1, %p1284_p9 }
  0x67   : > { %1294 = shalt.err (!%p1291_p2)
}
  0x68   : > { %1124 = dma.hbm_to_vmem [thread:$0]  (!%p1492_p11), %s1804_s4, 16, %s215_s7, [#allocation9]  }
  0x69   : > { %s1596_s14 = sadd.s32 1, %s1399_s21   ;;  %s30_s30 = sadd.s32 1, %s1395_s20 }
  0x6a   : > { %s27_s29 = ssub.s32 %s1399_s21, %s1596_s14  ;;  %p37_p13 = scmp.ne.s32.totalorder %s1395_s20, %s1391_s19 }
  0x6b   : > { %p28_p6 = scmp.eq.s32.totalorder %s27_s29, 0  ;;  %p38_p4 = scmp.eq.s32.totalorder %s1399_s21, 0 }
  0x6c   : > { %p1814_p8 = scmp.eq.s32.totalorder %s1462_s22, 1  ;;  %p1137_p3 = scmp.lt.s32.totalorder %s1399_s21, 2 }
  0x6d   : > { %s1612_s10 = scalar_select %p28_p6, %s1395_s20, %s30_s30  }
  0x6e   : > { %p1606_p10 = por %p1814_p8, %p37_p13  ;;  %p39_p5 = por %p38_p4, %p37_p13 }
  0x6f   : > { %s225_s11 = sand.u32 1, %s1395_s20   ;;  %s942_s7 = sshll.u32 %s1399_s21, 11 }
  0x70   : > { %s893_s12 = sshll.u32 %s225_s11, 7  ;;  %s1619_s16 = scalar_lea.hbm %s1800_s0, %s942_s7 }
  0x71   : > { %s229_s8 = scalar_lea.vmem [#allocation2], %s893_s12  ;;  %p1623_p11 = pnand %p1137_p3, %p39_p5 }
  0x72   : > { %s236_s6 = sshll.u32 %s229_s8, 4  ;;  %s1627_s17 = scalar_lea.sflag [#allocation3], %s225_s11  ;;  %s1621_s6 = int_to_ptr.vmem [resolvable:$true] %s236_s6 }
  0x73   : > { %s1295_s30 = scalar_lea.hbm %s1619_s16, 2048  ;;  %p1297_p9 = pneg %p1623_p11 }
  0x74   : > { %p1296_p7 = scmp.ne.s32.totalorder %s1619_s16, %s1295_s30  ;;  %s1300_s7 = scalar_lea.hbm %s1800_s0, 4096 }
  0x75   : > { %p1301_p1 = scmp.lt.u32.totalorder %s1619_s16, %s1800_s0  ;;  %p1302_p2 = scmp.lt.u32.totalorder %s1300_s7, %s1295_s30 }
  0x76   : > { %p1298_p12 = pnand %p1297_p9, %p1296_p7  ;;  %p1304_p6 = scmp.lt.u32.totalorder %s1295_s30, %s1619_s16 }
  0x77   : > { %p1303_p13 = por %p1302_p2, %p1301_p1 }
  0x78   : > { %p1299_p0 = pneg %p1298_p12 }
  0x79   : > { %p1305_p4 = por %p1304_p6, %p1303_p13 }
  0x7b   : > { %p1306_p8 = pnand %p1305_p4, %p1299_p0 }
  0x7d   : > { %1309 = shalt.err (!%p1306_p8)
}
  0x7e   : > { %s1310_s11 = scalar_lea.vmem %s1621_s6, 2048  ;;  %s1407_s8 = smov [#allocation2]  }
  0x7f   : > { %p1311_p3 = scmp.ne.s32.totalorder %s1621_s6, %s1310_s11  ;;  %s1315_s29 = sshll.u32 %s1407_s8, 4  ;;  %s1316_s29 = int_to_ptr.vmem [resolvable:$false] %s1315_s29 }
  0x80   : > { %s1317_s12 = scalar_lea.vmem %s1316_s29, 4096  ;;  %p1318_p12 = scmp.lt.s32.totalorder %s1621_s6, %s1316_s29 }
  0x81   : > { %p1313_p5 = pnand %p1311_p3, %p1297_p9  ;;  %p1319_p1 = scmp.lt.s32.totalorder %s1317_s12, %s1310_s11 }
  0x83   : > { %p1314_p7 = pneg %p1313_p5  ;;  %p1320_p2 = por %p1319_p1, %p1318_p12 }
  0x85   : > { %p1321_p13 = pnand %p1320_p2, %p1314_p7 }
  0x87   : > { %1324 = shalt.err (!%p1321_p13)
}
  0x88   : > { %1128 = dma.hbm_to_vmem [thread:$0]  (!%p1623_p11), %s1619_s16, 2048, %s1621_s6, %s1627_s17, %s1404_s23, %s1404_s23, %s1405_s27  }
  0x89   : > { %p1817_p9 = scmp.ne.s32.totalorder %s1811_s26, 0 }
  0x8a   : > { %s1661_s30 = sand.u32 (!%p1817_p9), 1, %s1391_s19   ;;  %p1818_p0 = scmp.ne.s32.totalorder (!%p1817_p9), %s1809_s24, 0 }
  0x8b   : > { %248 = sbr.rel (%p1817_p9) target bundleno = 641 (0x281), region = 40  ;;  %s897_s7 = sshll.u32 (!%p1817_p9), %s1661_s30, 7 }
  0x8c   : > { %s251_s13 = scalar_lea.sflag (!%p1817_p9), [#allocation3], %s1661_s30  ;;  %s1667_s28 = scalar_lea.vmem (!%p1817_p9), [#allocation2], %s897_s7 }
  0x92   : > { %1370 = dma.done.wait (%p1818_p0), %s251_s13, 2048  }
  0x93   : > { %1372 = vsyncadd (%p1818_p0), %s251_s13, 4294965248  ;;  %p1819_p11 = scmp.eq.s32.totalorder %s1462_s22, 0 }
  0x95   : > { %1374 = dma.done.wait (%p1819_p11), [#allocation6], 528   ;;  %p1820_p6 = pmov %p1819_p11 }
  0x97   : > { %1376 = vsyncadd (%p1820_p6), [#allocation6], 4294966768  ;;  %p1821_p4 = pmov %p1820_p6 }
  0x99   : > { %1378 = dma.done.wait (%p1821_p4), [#allocation9], 1040   ;;  %p1822_p8 = pmov %p1821_p4 }
  0x9a   : > { %vm326_vm0 = vcmask 261120   ;;  %v315_v0 = vld [vmem:[#allocation5] sm:$0xff]  ;;  %v316_v1 = vld [vmem:[#allocation5 + $0x8] sm:$0xff]  ;;  %v317_v2 = vld [vmem:[#allocation5 + $0x10] sm:$0xff]  ;;  %vm551_vm1 = vcmask 523264   ;;  %s1731_s24 = scalar_lea.vmem [#allocation11], %s897_s7 }
  0x9b   : > { %1380 = vsyncadd (%p1822_p8), [#allocation9], 4294966256  ;;  %v1060_v3 = vpack.c.bf16 %v316_v1, %v315_v0  ;;  %v318_v4 = vld [vmem:[#allocation5 + $0x18] sm:$0xff]  ;;  %v299_v5 = vld [vmem:[%s1667_s28] sm:$0xff]  ;;  %s943_s26 = sshll.u32 %s1462_s22, 11  ;;  %s775_s23 = sshll.u32 %s1731_s24, 4  ;;  %s1754_s23 = int_to_ptr.vmem [resolvable:$true] %s775_s23 }
  0x9c   : > { %v1064_v6 = vpack.c.bf16 %v318_v4, %v317_v2  ;;  %996 = vmatprep.mubr.msk.f32.mxu0 %vm326_vm0, %v299_v5  ;;  %v536_v7 = vld [vmem:[#allocation8] sm:$0xff]  ;;  %v537_v8 = vld [vmem:[#allocation8 + $0x8] sm:$0xff]  ;;  %v538_v9 = vld [vmem:[#allocation8 + $0x10] sm:$0xff]  ;;  %s1752_s6 = scalar_lea.hbm %s1805_s5, %s943_s26  ;;  %s762_s22 = scalar_lea.sflag [#allocation4], %s1661_s30 }
  0x9d   : > { %1061 = vmatprep.subr.bf16.mxu0 %v1060_v3  ;;  %v539_v10 = vld [vmem:[#allocation8 + $0x18] sm:$0xff]  ;;  %v300_v11 = vld [vmem:[%s1667_s28 + $0x8] sm:$0xff]  ;;  %v1068_v12 = vpack.c.bf16 %v537_v8, %v536_v7  ;;  %v301_v13 = vld [vmem:[%s1667_s28 + $0x10] sm:$0xff]  ;;  %s1325_s17 = scalar_lea.vmem %s1754_s23, 2048  ;;  %s1408_s15 = smov [#allocation11]  }
  0x9e   : > { %1063 = vmatpush3.bf16.msra.mxu0 %v1060_v3  ;;  %v1072_v14 = vpack.c.bf16 %v539_v10, %v538_v9  ;;  %v540_v15 = vld [vmem:[#allocation8 + $0x20] sm:$0xff]  ;;  %v541_v16 = vld [vmem:[#allocation8 + $0x28] sm:$0xff]  ;;  %v302_v17 = vld [vmem:[%s1667_s28 + $0x18] sm:$0xff]  ;;  %p1326_p3 = scmp.ne.s32.totalorder %s1754_s23, %s1325_s17  ;;  %s1329_s11 = sshll.u32 %s1408_s15, 4  ;;  %s1330_s11 = int_to_ptr.vmem [resolvable:$false] %s1329_s11 }
  0x9f   : > { %1065 = vmatprep.subr.bf16.mxu0 %v1064_v6  ;;  %1084 = vmatprep.subr.bf16.mxu1 %v1068_v12  ;;  %v303_v18 = vld [vmem:[%s1667_s28 + $0x20] sm:$0xff]  ;;  %v1076_v19 = vpack.c.bf16 %v541_v16, %v540_v15  ;;  %v304_v20 = vld [vmem:[%s1667_s28 + $0x28] sm:$0xff]  ;;  %v305_v21 = vld [vmem:[%s1667_s28 + $0x30] sm:$0xff]  ;;  %s1331_s8 = scalar_lea.vmem %s1330_s11, 4096  ;;  %p1332_p12 = scmp.lt.s32.totalorder %s1754_s23, %s1330_s11 }
  0xa0   : > { %1088 = vmatpush3.bf16.msra.mxu1 %v1068_v12  ;;  %v306_v22 = vld [vmem:[%s1667_s28 + $0x38] sm:$0xff]  ;;  %v307_v23 = vld [vmem:[%s1667_s28 + $0x40] sm:$0xff]  ;;  %v308_v24 = vld [vmem:[%s1667_s28 + $0x48] sm:$0xff]  ;;  %p1327_p5 = pnand %p1326_p3, %p1606_p10  ;;  %p1333_p1 = scmp.lt.s32.totalorder %s1331_s8, %s1325_s17 }
  0xa1   : > { %1085 = vmatprep.subr.bf16.mxu1 %v1072_v14  ;;  %v309_v25 = vld [vmem:[%s1667_s28 + $0x50] sm:$0xff]  ;;  %v310_v26 = vld [vmem:[%s1667_s28 + $0x58] sm:$0xff]  ;;  %v311_v27 = vld [vmem:[%s1667_s28 + $0x60] sm:$0xff] }
  0xa2   : > { %1067 = vmatpush3.bf16.msra.mxu0 %v1064_v6  ;;  %v312_v28 = vld [vmem:[%s1667_s28 + $0x68] sm:$0xff]  ;;  %v313_v29 = vld [vmem:[%s1667_s28 + $0x70] sm:$0xff]  ;;  %v314_v30 = vld [vmem:[%s1667_s28 + $0x78] sm:$0xff]  ;;  %p1328_p7 = pneg %p1327_p5  ;;  %p1334_p2 = por %p1333_p1, %p1332_p12 }
  0xa3   : > { %1069 = vmatprep.subr.bf16.mxu0 %v1068_v12  ;;  %v542_v31 = vld [vmem:[#allocation8 + $0x30] sm:$0xff]  ;;  %v543_v32 = vld [vmem:[#allocation8 + $0x38] sm:$0xff] }
  0xa4   : > { %1089 = vmatpush3.bf16.msra.mxu1 %v1072_v14  ;;  %v1080_v33 = vpack.c.bf16 %v543_v32, %v542_v31  ;;  %v903_v34 = vld [vmem:[#allocation7] ss:$0 sm:$0xff]  ;;  %p1335_p13 = pnand %p1334_p2, %p1328_p7 }
  0xa5   : > { %997 = vmatmul.mubr.msk.f32.vlgmr.msra.gmra.mrb[0].mxu0 %vm326_vm0, %v300_v11  ;;  %1086 = vmatprep.subr.bf16.mxu1 %v1076_v19 }
  0xa6   : > { %999 = vmatprep.mubr.msk.f32.mxu0 %vm326_vm0, %v301_v13  ;;  %1071 = vmatpush3.bf16.msra.mxu0 %v1068_v12 }
  0xa7   : > { %1073 = vmatprep.subr.bf16.mxu0 %v1072_v14 }
  0xa8   : > { %1090 = vmatpush3.bf16.msra.mxu1 %v1076_v19 }
  0xa9   : > { %1000 = vmatmul.mubr.msk.f32.gmra.mrb[2].mxu0 %vm326_vm0, %v302_v17  ;;  %1087 = vmatprep.subr.bf16.mxu1 %v1080_v33 }
  0xaa   : > { %1002 = vmatprep.mubr.msk.f32.mxu0 %vm326_vm0, %v303_v18  ;;  %1075 = vmatpush3.bf16.msra.mxu0 %v1072_v14 }
  0xab   : > { %1077 = vmatprep.subr.bf16.mxu0 %v1076_v19 }
  0xac   : > { %1091 = vmatpush3.bf16.msra.mxu1 %v1080_v33 }
  0xad   : > { %1003 = vmatmul.mubr.msk.f32.gmra.mrb[4].mxu0 %vm326_vm0, %v304_v20 }
  0xae   : > { %1005 = vmatprep.mubr.msk.f32.mxu0 %vm326_vm0, %v305_v21  ;;  %1079 = vmatpush3.bf16.msra.mxu0 %v1076_v19  ;;  %v920_v19 = vld [vmem:[#allocation10] ss:$0 sm:$0xff] }
  0xaf   : > { %1081 = vmatprep.subr.bf16.mxu0 %v1080_v33 }
  0xb1   : > { %1006 = vmatmul.mubr.msk.f32.gmra.mrb[6].mxu0 %vm326_vm0, %v306_v22 }
  0xb2   : > { %1008 = vmatprep.mubr.msk.f32.mxu0 %vm326_vm0, %v307_v23  ;;  %1083 = vmatpush3.bf16.msra.mxu0 %v1080_v33 }
  0xb5   : > { %1009 = vmatmul.mubr.msk.f32.gmra.mrb[8].mxu0 %vm326_vm0, %v308_v24 }
  0xb6   : > { %1011 = vmatprep.mubr.msk.f32.mxu0 %vm326_vm0, %v309_v25 }
  0xb9   : > { %1012 = vmatmul.mubr.msk.f32.gmra.mrb[10].mxu0 %vm326_vm0, %v310_v26 }
  0xba   : > { %1014 = vmatprep.mubr.msk.f32.mxu0 %vm326_vm0, %v311_v27 }
  0xbd   : > { %1015 = vmatmul.mubr.msk.f32.gmra.mrb[12].mxu0 %vm326_vm0, %v312_v28 }
  0xbe   : > { %1017 = vmatprep.mubr.msk.f32.mxu0 %vm326_vm0, %v313_v29 }
  0xc1   : > { %1018 = vmatmul.mubr.msk.f32.gmra.mrb[14].mxu0 %vm326_vm0, %v314_v30 }
 0x178   : > { %v998_v35 = vpop.f32.mrb[0].mxu0 }
 0x179   : > { %v447_v36 = vadd.f32 %v998_v35, %v903_v34  ;;  %v441_v37 = vpop.f32.mrb[1].mxu0 }
 0x17a   : > { %v442_v38 = vadd.f32 %v903_v34, %v441_v37 }
 0x17b   : > { %v521_v41 = vmax.f32 %v447_v36, 0.0 }
 0x17c   : > { %v520_v39 = vmax.f32 %v442_v38, 0.0  ;;  %v1001_v40 = vpop.f32.mrb[2].mxu0 }
 0x17d   : > { %v457_v42 = vadd.f32 %v1001_v40, %v903_v34  ;;  %v451_v43 = vpop.f32.mrb[3].mxu0 }
 0x17e   : > { %v452_v44 = vadd.f32 %v903_v34, %v451_v43  ;;  %1036 = vmatprep.mubr.msk.f32.mxu0 %vm551_vm1, %v520_v39 }
 0x17f   : > { %1037 = vmatmul.mubr.msk.f32.vlgmr.msra.gmra.mrb[16].mxu0 %vm551_vm1, %v521_v41  ;;  %v523_v47 = vmax.f32 %v457_v42, 0.0 }
 0x180   : > { %v522_v45 = vmax.f32 %v452_v44, 0.0  ;;  %v1004_v46 = vpop.f32.mrb[4].mxu0 }
 0x181   : > { %v467_v48 = vadd.f32 %v1004_v46, %v903_v34  ;;  %v461_v49 = vpop.f32.mrb[5].mxu0 }
 0x182   : > { %v462_v50 = vadd.f32 %v903_v34, %v461_v49  ;;  %1039 = vmatprep.mubr.msk.f32.mxu1 %vm551_vm1, %v522_v45 }
 0x183   : > { %1040 = vmatmul.mubr.msk.f32.vlgmr.msra.gmra.mrb[0].mxu1 %vm551_vm1, %v523_v47  ;;  %v525_v53 = vmax.f32 %v467_v48, 0.0 }
 0x184   : > { %v524_v51 = vmax.f32 %v462_v50, 0.0  ;;  %v1007_v52 = vpop.f32.mrb[6].mxu0 }
 0x185   : > { %v477_v54 = vadd.f32 %v1007_v52, %v903_v34  ;;  %v471_v55 = vpop.f32.mrb[7].mxu0 }
 0x186   : > { %v472_v56 = vadd.f32 %v903_v34, %v471_v55  ;;  %1042 = vmatprep.mubr.msk.f32.mxu1 %vm551_vm1, %v524_v51 }
 0x187   : > { %1043 = vmatmul.mubr.msk.f32.gmra.mrb[2].mxu1 %vm551_vm1, %v525_v53  ;;  %v527_v59 = vmax.f32 %v477_v54, 0.0 }
 0x188   : > { %v526_v57 = vmax.f32 %v472_v56, 0.0  ;;  %v1010_v58 = vpop.f32.mrb[8].mxu0 }
 0x189   : > { %v487_v60 = vadd.f32 %v1010_v58, %v903_v34  ;;  %v481_v61 = vpop.f32.mrb[9].mxu0 }
 0x18a   : > { %v482_v62 = vadd.f32 %v903_v34, %v481_v61  ;;  %1045 = vmatprep.mubr.msk.f32.mxu1 %vm551_vm1, %v526_v57 }
 0x18b   : > { %1046 = vmatmul.mubr.msk.f32.gmra.mrb[4].mxu1 %vm551_vm1, %v527_v59  ;;  %v529_v1 = vmax.f32 %v487_v60, 0.0 }
 0x18c   : > { %v528_v63 = vmax.f32 %v482_v62, 0.0  ;;  %v1013_v0 = vpop.f32.mrb[10].mxu0 }
 0x18d   : > { %v497_v2 = vadd.f32 %v1013_v0, %v903_v34  ;;  %v491_v3 = vpop.f32.mrb[11].mxu0 }
 0x18e   : > { %v492_v4 = vadd.f32 %v903_v34, %v491_v3  ;;  %1048 = vmatprep.mubr.msk.f32.mxu1 %vm551_vm1, %v528_v63 }
 0x18f   : > { %1049 = vmatmul.mubr.msk.f32.gmra.mrb[6].mxu1 %vm551_vm1, %v529_v1  ;;  %v531_v7 = vmax.f32 %v497_v2, 0.0 }
 0x190   : > { %v530_v5 = vmax.f32 %v492_v4, 0.0  ;;  %v1016_v6 = vpop.f32.mrb[12].mxu0 }
 0x191   : > { %v507_v8 = vadd.f32 %v1016_v6, %v903_v34  ;;  %v501_v9 = vpop.f32.mrb[13].mxu0 }
 0x192   : > { %v502_v10 = vadd.f32 %v903_v34, %v501_v9  ;;  %1051 = vmatprep.mubr.msk.f32.mxu1 %vm551_vm1, %v530_v5 }
 0x193   : > { %1052 = vmatmul.mubr.msk.f32.gmra.mrb[8].mxu1 %vm551_vm1, %v531_v7  ;;  %v533_v13 = vmax.f32 %v507_v8, 0.0 }
 0x194   : > { %v532_v11 = vmax.f32 %v502_v10, 0.0  ;;  %v1019_v12 = vpop.f32.mrb[14].mxu0 }
 0x195   : > { %v517_v14 = vadd.f32 %v1019_v12, %v903_v34  ;;  %v511_v15 = vpop.f32.mrb[15].mxu0 }
 0x196   : > { %v512_v16 = vadd.f32 %v903_v34, %v511_v15  ;;  %1054 = vmatprep.mubr.msk.f32.mxu1 %vm551_vm1, %v532_v11 }
 0x197   : > { %1055 = vmatmul.mubr.msk.f32.gmra.mrb[10].mxu1 %vm551_vm1, %v533_v13  ;;  %v535_v18 = vmax.f32 %v517_v14, 0.0 }
 0x198   : > { %v534_v17 = vmax.f32 %v512_v16, 0.0 }
 0x19a   : > { %1057 = vmatprep.mubr.msk.f32.mxu1 %vm551_vm1, %v534_v17 }
 0x19b   : > { %1058 = vmatmul.mubr.msk.f32.gmra.mrb[12].mxu1 %vm551_vm1, %v535_v18 }
 0x252   : > { %v1038_v20 = vpop.f32.mrb[16].mxu0 }
 0x253   : > { %v672_v21 = vadd.f32 %v1038_v20, %v920_v19  ;;  %v666_v22 = vpop.f32.mrb[17].mxu0 }
 0x254   : > { %v667_v23 = vadd.f32 %v920_v19, %v666_v22 }
 0x255   : > { %746 = vst [vmem:[%s1731_s24 + $0x8] sm:$0xff] %v672_v21 }
 0x256   : > { %745 = vst [vmem:[%s1731_s24] sm:$0xff] %v667_v23  ;;  %v1041_v24 = vpop.f32.mrb[0].mxu1 }
 0x257   : > { %v682_v25 = vadd.f32 %v1041_v24, %v920_v19  ;;  %v676_v26 = vpop.f32.mrb[1].mxu1 }
 0x258   : > { %v677_v27 = vadd.f32 %v920_v19, %v676_v26 }
 0x259   : > { %748 = vst [vmem:[%s1731_s24 + $0x18] sm:$0xff] %v682_v25 }
 0x25a   : > { %747 = vst [vmem:[%s1731_s24 + $0x10] sm:$0xff] %v677_v27  ;;  %v1044_v28 = vpop.f32.mrb[2].mxu1 }
 0x25b   : > { %v692_v29 = vadd.f32 %v1044_v28, %v920_v19  ;;  %v686_v30 = vpop.f32.mrb[3].mxu1 }
 0x25c   : > { %v687_v31 = vadd.f32 %v920_v19, %v686_v30 }
 0x25d   : > { %750 = vst [vmem:[%s1731_s24 + $0x28] sm:$0xff] %v692_v29 }
 0x25e   : > { %749 = vst [vmem:[%s1731_s24 + $0x20] sm:$0xff] %v687_v31  ;;  %v1047_v32 = vpop.f32.mrb[4].mxu1 }
 0x25f   : > { %v702_v33 = vadd.f32 %v1047_v32, %v920_v19  ;;  %v696_v34 = vpop.f32.mrb[5].mxu1 }
 0x260   : > { %v697_v35 = vadd.f32 %v920_v19, %v696_v34 }
 0x261   : > { %752 = vst [vmem:[%s1731_s24 + $0x38] sm:$0xff] %v702_v33 }
 0x262   : > { %751 = vst [vmem:[%s1731_s24 + $0x30] sm:$0xff] %v697_v35  ;;  %v1050_v36 = vpop.f32.mrb[6].mxu1 }
 0x263   : > { %v712_v37 = vadd.f32 %v1050_v36, %v920_v19  ;;  %v706_v38 = vpop.f32.mrb[7].mxu1 }
 0x264   : > { %v707_v39 = vadd.f32 %v920_v19, %v706_v38 }
 0x265   : > { %754 = vst [vmem:[%s1731_s24 + $0x48] sm:$0xff] %v712_v37 }
 0x266   : > { %753 = vst [vmem:[%s1731_s24 + $0x40] sm:$0xff] %v707_v39  ;;  %v1053_v40 = vpop.f32.mrb[8].mxu1 }
 0x267   : > { %v722_v41 = vadd.f32 %v1053_v40, %v920_v19  ;;  %v716_v42 = vpop.f32.mrb[9].mxu1 }
 0x268   : > { %v717_v43 = vadd.f32 %v920_v19, %v716_v42 }
 0x269   : > { %756 = vst [vmem:[%s1731_s24 + $0x58] sm:$0xff] %v722_v41 }
 0x26a   : > { %755 = vst [vmem:[%s1731_s24 + $0x50] sm:$0xff] %v717_v43  ;;  %v1056_v44 = vpop.f32.mrb[10].mxu1 }
 0x26b   : > { %v732_v45 = vadd.f32 %v1056_v44, %v920_v19  ;;  %v726_v46 = vpop.f32.mrb[11].mxu1 }
 0x26c   : > { %v727_v47 = vadd.f32 %v920_v19, %v726_v46 }
 0x26d   : > { %758 = vst [vmem:[%s1731_s24 + $0x68] sm:$0xff] %v732_v45 }
 0x26e   : > { %757 = vst [vmem:[%s1731_s24 + $0x60] sm:$0xff] %v727_v47  ;;  %v1059_v48 = vpop.f32.mrb[12].mxu1 }
 0x26f   : > { %v742_v49 = vadd.f32 %v1059_v48, %v920_v19  ;;  %v736_v50 = vpop.f32.mrb[13].mxu1 }
 0x270   : > { %v737_v51 = vadd.f32 %v920_v19, %v736_v50 }
 0x271   : > { %760 = vst [vmem:[%s1731_s24 + $0x78] sm:$0xff] %v742_v49 }
 0x272   : > { %759 = vst [vmem:[%s1731_s24 + $0x70] sm:$0xff] %v737_v51 }
 0x273   : > { %1338 = shalt.err (!%p1335_p13)
}
 0x274   : > { %s1339_s29 = scalar_lea.hbm %s1752_s6, 2048  ;;  %s1343_s13 = scalar_lea.hbm %s1805_s5, 4096 }
 0x275   : > { %p1340_p9 = scmp.ne.s32.totalorder %s1752_s6, %s1339_s29  ;;  %p1344_p6 = scmp.lt.u32.totalorder %s1752_s6, %s1805_s5 }
 0x276   : > { %p1345_p4 = scmp.lt.u32.totalorder %s1343_s13, %s1339_s29  ;;  %p1347_p3 = scmp.lt.u32.totalorder %s1339_s29, %s1752_s6 }
 0x277   : > { %p1341_p0 = pnand %p1340_p9, %p1606_p10 }
 0x278   : > { %p1346_p8 = por %p1345_p4, %p1344_p6 }
 0x279   : > { %p1342_p11 = pneg %p1341_p0 }
 0x27a   : > { %p1348_p5 = por %p1347_p3, %p1346_p8 }
 0x27c   : > { %p1349_p7 = pnand %p1348_p5, %p1342_p11 }
 0x27e   : > { %1352 = shalt.err (!%p1349_p7)
}
 0x27f   : > { %s1409_s26 = smov 128   ;;  %s1410_s27 = smov 8  }
 0x280   : > { %1110 = dma.vmem_to_hbm [thread:$0]  (%p1606_p10), %s1754_s23, 2048, %s1752_s6, %s762_s22, %s1409_s26, %s1409_s26, %s1410_s27  }
 0x281 PF: > { %s790_s16 = sand.u32 1, %s1387_s18   ;;  %p1823_p12 = scmp.ne.s32.totalorder %s1810_s25, 0 }
 0x282   : > { %p1824_p1 = scmp.ge.s32.totalorder %s1399_s21, 2  ;;  %s791_s17 = scalar_lea.sflag [#allocation4], %s790_s16 }
 0x284   : > { %p1130_p2 = pnand %p1824_p1, %p1823_p12 }
 0x286   : > { %1382 = dma.done.wait (!%p1130_p2), %s791_s17, 2048  }
 0x287   : > { %1384 = vsyncadd (!%p1130_p2), %s791_s17, 4294965248  ;;  %p20_p13 = scmp.ge.s32.totalorder %s1596_s14, 4   ;;  %s1825_s18 = smov %s1391_s19 }
 0x288   : > { %s1826_s19 = smov %s1395_s20  ;;  %s1827_s20 = smov %s1612_s10 }
 0x289   : > { %s1828_s21 = smov %s1596_s14  ;;  %22 = sbr.rel (!%p20_p13) target bundleno = 7 (0x7), region = 101 }
 0x290   :  { %796 = vsyncpa [#allocation3], 1 }
 0x291   :  { %798 = vsyncpa [#allocation3 + $0x1], 1 }
 0x292   :  { %799 = vsyncpa [#allocation6], 1 }
 0x293   :  { %800 = vsyncpa [#allocation9], 1 }
 0x294   :  { %801 = vsyncpa [#allocation4], 1 }
 0x295   :  { %803 = vsyncpa [#allocation4 + $0x1], 1 }

</bundles_post_ra>
